<compile_context>
chip_gen: v6e
topology: v6e:2x2x1
jax: 0.10.0
libtpu: 0.0.40
codegen_flags: <defaults>
</compile_context>

<pallas_src>
import functools

import jax
import jax.numpy as jnp
from jax.experimental import pallas as pl
from jax.experimental.pallas import tpu as pltpu


def _round_up(x, m):
    return ((x + m - 1) // m) * m


def _cdiv(a, b):
    return (a + b - 1) // b


def _focal_terms(logits, targets, alpha, class_axis, gamma):
    """Per-example focal loss with the class dimension along `class_axis`.

    logits:  f32, classes along `class_axis`
    targets: i32, size-1 along `class_axis` (broadcasts against logits)
    alpha:   f32, size-1 along the non-class axis (broadcasts against logits)
    Returns an array shaped like logits with `class_axis` reduced to 1.
    """
    class_ids = jax.lax.broadcasted_iota(jnp.int32, logits.shape, dimension=class_axis)
    onehot = class_ids == targets                       # one-hot select, no gather

    # Numerically stable softmax statistics along the class axis.
    cmax = jnp.max(logits, axis=class_axis, keepdims=True)
    shifted = logits - cmax
    exp_shifted = jnp.exp(shifted)
    sum_exp = jnp.sum(exp_shifted, axis=class_axis, keepdims=True)
    # Target logit / exp selected via where so -inf * 0 can never produce NaN.
    picked = jnp.sum(jnp.where(onehot, shifted, 0.0), axis=class_axis, keepdims=True)
    exp_picked = jnp.sum(jnp.where(onehot, exp_shifted, 0.0), axis=class_axis, keepdims=True)
    # alpha[target] computed in-kernel from the same one-hot (no HBM gather).
    alpha_t = jnp.sum(jnp.where(onehot, alpha, 0.0), axis=class_axis, keepdims=True)

    # ce = logsumexp(logits) - logits[target]  (cmax cancels out).
    ce = jnp.log(sum_exp) - picked
    # pt = softmax(logits)[target]; approx reciprocal rides the idle EUP slot
    # (~1e-4 relative error, within test tolerance).
    pt = exp_picked * pl.reciprocal(sum_exp, approx=True)
    one_minus_pt = jnp.maximum(1.0 - pt, 0.0)           # clamp vs fp rounding

    g = float(gamma)
    if g == 2.0:
        weight = one_minus_pt * one_minus_pt            # single VPU mul, no pow
    elif g.is_integer() and 0.0 <= g <= 8.0:
        weight = jnp.ones_like(one_minus_pt)
        for _ in range(int(g)):
            weight = weight * one_minus_pt
    else:
        weight = one_minus_pt ** jnp.float32(g)         # non-integer gamma only
    return alpha_t * weight * ce


def _focal_small_kernel(logits_ref, targets_ref, alpha_ref, out_ref, *, gamma, n_valid):
    # logits_ref : (N_pad, C)  batch on sublanes, classes on lanes (lane-padded)
    # targets_ref: (N_pad, 1)  int32
    # alpha_ref  : (1, C)      f32
    # out_ref    : (1, 128)    f32, total focal-loss sum in lane 0
    logits = logits_ref[...].astype(jnp.float32)
    targets = targets_ref[...]
    alpha = alpha_ref[...].astype(jnp.float32)

    focal = _focal_terms(logits, targets, alpha, class_axis=1, gamma=gamma)   # (N_pad, 1)

    n_pad = logits.shape[0]
    row_ids = jax.lax.broadcasted_iota(jnp.int32, (n_pad, 1), dimension=0)
    focal = jnp.where(row_ids < n_valid, focal, 0.0)    # zero padded rows

    total = jnp.sum(focal, axis=0, keepdims=True)       # (1, 1)
    lane_ids = jax.lax.broadcasted_iota(jnp.int32, (1, 128), dimension=1)
    out_ref[...] = jnp.where(lane_ids == 0, total, 0.0).astype(out_ref.dtype)


def _focal_tiled_kernel(logits_ref, targets_ref, alpha_ref, out_ref, *, gamma, n_valid):
    # logits_ref : (C, TILE_N)  classes on sublanes, batch on the 128-lane axis
    # targets_ref: (1, TILE_N)  int32
    # alpha_ref  : (C, 1)       f32
    # out_ref    : (1, 128)     f32, this tile's focal-loss partial sum in lane 0
    logits = logits_ref[...].astype(jnp.float32)
    targets = targets_ref[...]
    alpha = alpha_ref[...].astype(jnp.float32)

    focal = _focal_terms(logits, targets, alpha, class_axis=0, gamma=gamma)   # (1, TILE_N)

    t = logits.shape[1]
    lane_idx = pl.program_id(0) * t + jax.lax.broadcasted_iota(jnp.int32, (1, t), dimension=1)
    focal = jnp.where(lane_idx < n_valid, focal, 0.0)   # zero padded lanes

    partial = jnp.sum(focal, axis=1, keepdims=True)     # (1, 1)
    lane_ids = jax.lax.broadcasted_iota(jnp.int32, (1, 128), dimension=1)
    out_ref[...] = jnp.where(lane_ids == 0, partial, 0.0).astype(out_ref.dtype)


def _focal_loss_small(logits, targets, alpha, gamma):
    """Grid-less single-block path for small (MELD-sized) batches."""
    n, c = logits.shape
    n_pad = max(8, _round_up(n, 8))
    logits_p = jnp.pad(logits, ((0, n_pad - n), (0, 0)))
    targets_p = jnp.pad(targets.astype(jnp.int32), (0, n_pad - n)).reshape(n_pad, 1)
    alpha_row = alpha.astype(jnp.float32).reshape(1, c)

    kernel = functools.partial(_focal_small_kernel, gamma=float(gamma), n_valid=n)
    out = pl.pallas_call(
        kernel,
        out_shape=jax.ShapeDtypeStruct((1, 128), jnp.float32),
        compiler_params=pltpu.CompilerParams(vmem_limit_bytes=32 * 1024 * 1024),
    )(logits_p, targets_p, alpha_row)
    # Only lane 0 is non-zero, so this sum is exact; divide by the true N.
    return jnp.sum(out) / jnp.float32(n)


def _focal_loss_tiled(logits, targets, alpha, gamma, tile_n):
    """Tiled, transposed lane-dense path for large batches."""
    n, c = logits.shape
    n_pad128 = _round_up(n, 128)

    tile_req = max(128, (int(tile_n) // 128) * 128)
    num_tiles = max(1, _cdiv(n_pad128, tile_req))
    # Keep the "parallel" grid wide enough to span both v7x TensorCores (and to
    # pipeline) for large batches; irrelevant/negligible on v5e/v6e.
    if n_pad128 >= 4 * 128:
        num_tiles = max(num_tiles, 4)
    tile_n = _round_up(_cdiv(n_pad128, num_tiles), 128)
    num_tiles = _cdiv(n_pad128, tile_n)
    n_pad = num_tiles * tile_n   # over-padding bounded by ~num_tiles * 128 examples

    targets = targets.astype(jnp.int32)
    # Transposed, lane-dense layout: classes on sublanes, batch on lanes.
    # Input dtype (e.g. bf16) is preserved; the kernel upcasts to f32.
    # TODO(synk): ideally the producer emits logits already as [C, N] so this
    # wrapper transpose (an extra HBM read+write of the dominant array) disappears.
    logits_t = jnp.zeros((c, n_pad), logits.dtype).at[:, :n].set(logits.T)
    targets_row = jnp.zeros((1, n_pad), jnp.int32).at[0, :n].set(targets)
    alpha_col = alpha.astype(jnp.float32).reshape(c, 1)

    kernel = functools.partial(_focal_tiled_kernel, gamma=float(gamma), n_valid=n)
    partials = pl.pallas_call(
        kernel,
        out_shape=jax.ShapeDtypeStruct((1, 128 * num_tiles), jnp.float32),
        grid=(num_tiles,),
        in_specs=[
            pl.BlockSpec((c, tile_n), lambda i: (0, i)),
            pl.BlockSpec((1, tile_n), lambda i: (0, i)),
            pl.BlockSpec((c, 1), lambda i: (0, 0)),
        ],
        out_specs=pl.BlockSpec((1, 128), lambda i: (0, i)),
        compiler_params=pltpu.CompilerParams(
            dimension_semantics=("parallel",),
            # v7x guardrail: stay under the 32 MiB scoped-VMEM default
            # (64 MiB physical); tile_n=65536 f32 double-buffered is ~4 MiB.
            vmem_limit_bytes=32 * 1024 * 1024,
        ),
    )(logits_t, targets_row, alpha_col)
    # Each tile wrote its partial sum in lane 0 of its 128-lane slab; exact.
    return jnp.sum(partials) / jnp.float32(n)


def focal_loss(logits, targets, alpha, gamma=2.0, tile_n=65536, small_batch_max=4096):
    """Pallas TPU focal loss (forward).

    logits:  [N, C] float32 or bfloat16 (upcast to f32 inside the kernel)
    targets: [N]    int32 class indices
    alpha:   [C]    float32 per-class weights
    returns scalar float32 (mean focal loss)
    """
    n, _ = logits.shape
    if n <= small_batch_max:
        return _focal_loss_small(logits, targets, alpha, gamma)
    return _focal_loss_tiled(logits, targets, alpha, gamma, tile_n)


def focal_loss_ref(logits, targets, alpha, gamma=2.0):
    """Pure-JAX reference for correctness checking."""
    logits = logits.astype(jnp.float32)
    lse = jax.nn.logsumexp(logits, axis=-1)
    picked = jnp.take_along_axis(logits, targets[:, None].astype(jnp.int32), axis=-1)[:, 0]
    ce = lse - picked
    pt = jnp.exp(-ce)
    focal = alpha.astype(jnp.float32)[targets] * (1.0 - pt) ** gamma * ce
    return jnp.mean(focal)


if __name__ == "__main__":
    key = jax.random.PRNGKey(0)
    k1, k2, k3, k4, k5, k6, k7 = jax.random.split(key, 7)

    # MELD emotion recognition: 7 emotion classes.
    C = 7
    alpha = jax.random.uniform(k3, (C,), dtype=jnp.float32, minval=0.5, maxval=1.5)

    # Case 1: small batch -> grid-less single-block fast path ([N, C] in, no wrapper ops).
    N1 = 64
    logits1 = jax.random.normal(k1, (N1, C), dtype=jnp.float32)
    targets1 = jax.random.randint(k2, (N1,), 0, C, dtype=jnp.int32)
    out1 = jax.block_until_ready(focal_loss(logits1, targets1, alpha, gamma=2.0))
    ref1 = focal_loss_ref(logits1, targets1, alpha, gamma=2.0)
    assert jnp.allclose(out1, ref1, rtol=1e-3, atol=1e-5), (out1, ref1)

    # Case 2: forced tiled path, multi-tile grid with a remainder (exercises
    # in-kernel lane masking, in-kernel alpha select, per-tile partial sums).
    N2 = 1000
    logits2 = jax.random.normal(k4, (N2, C), dtype=jnp.float32)
    targets2 = jax.random.randint(k5, (N2,), 0, C, dtype=jnp.int32)
    out2 = jax.block_until_ready(
        focal_loss(logits2, targets2, alpha, gamma=2.0, tile_n=256, small_batch_max=0))
    ref2 = focal_loss_ref(logits2, targets2, alpha, gamma=2.0)
    assert jnp.allclose(out2, ref2, rtol=1e-3, atol=1e-5), (out2, ref2)

    # Case 3: bf16 logits through the tiled path (dtype passes through; kernel upcasts).
    N3 = 777
    logits3 = jax.random.normal(k6, (N3, C), dtype=jnp.float32).astype(jnp.bfloat16)
    targets3 = jax.random.randint(k7, (N3,), 0, C, dtype=jnp.int32)
    out3 = jax.block_until_ready(
        focal_loss(logits3, targets3, alpha, gamma=2.0, tile_n=128, small_batch_max=0))
    ref3 = focal_loss_ref(logits3, targets3, alpha, gamma=2.0)
    assert jnp.allclose(out3, ref3, rtol=1e-3, atol=1e-5), (out3, ref3)

    print("KERNEL_OK")
</pallas_src>

<mosaic_0001>
module attributes {stable_mosaic.version = 11 : i64} {
  func.func @_focal_small_kernel(%arg0: memref<64x7xf32, #tpu.memory_space<vmem>>, %arg1: memref<64x1xi32, #tpu.memory_space<vmem>>, %arg2: memref<1x7xf32, #tpu.memory_space<vmem>>, %arg3: memref<1x128xf32, #tpu.memory_space<vmem>>) attributes {dimension_semantics = [], scalar_prefetch = 0 : i64, scratch_operands = 0 : i64, tpu.core_type = #tpu.core_type<tc>} {
    %c0 = arith.constant 0 : index
    %c0_0 = arith.constant 0 : index
    %0 = vector.load %arg0[%c0, %c0_0] : memref<64x7xf32, #tpu.memory_space<vmem>>, vector<64x7xf32>
    %c0_1 = arith.constant 0 : index
    %c0_2 = arith.constant 0 : index
    %1 = vector.load %arg1[%c0_1, %c0_2] : memref<64x1xi32, #tpu.memory_space<vmem>>, vector<64x1xi32>
    %c0_3 = arith.constant 0 : index
    %c0_4 = arith.constant 0 : index
    %2 = vector.load %arg2[%c0_3, %c0_4] : memref<1x7xf32, #tpu.memory_space<vmem>>, vector<1x7xf32>
    %3 = tpu.iota {dimensions = array<i32: 1>} : vector<64x7xi32>
    %4 = vector.broadcast %1 : vector<64x1xi32> to vector<64x7xi32>
    %5 = arith.cmpi eq, %3, %4 : vector<64x7xi32>
    %cst = arith.constant dense<0xFF800000> : vector<64xf32>
    %6 = vector.multi_reduction <maximumf>, %0, %cst [1] : vector<64x7xf32> to vector<64xf32>
    %7 = vector.shape_cast %6 : vector<64xf32> to vector<64x1xf32>
    %8 = vector.broadcast %7 : vector<64x1xf32> to vector<64x7xf32>
    %9 = arith.subf %0, %8 : vector<64x7xf32>
    %10 = math.exp %9 : vector<64x7xf32>
    %cst_5 = arith.constant dense<0.000000e+00> : vector<64xf32>
    %11 = vector.multi_reduction <add>, %10, %cst_5 [1] : vector<64x7xf32> to vector<64xf32>
    %12 = vector.shape_cast %11 : vector<64xf32> to vector<64x1xf32>
    %cst_6 = arith.constant 0.000000e+00 : f32
    %13 = vector.broadcast %cst_6 : f32 to vector<64x7xf32>
    %14 = arith.select %5, %9, %13 : vector<64x7xi1>, vector<64x7xf32>
    %cst_7 = arith.constant dense<0.000000e+00> : vector<64xf32>
    %15 = vector.multi_reduction <add>, %14, %cst_7 [1] : vector<64x7xf32> to vector<64xf32>
    %16 = vector.shape_cast %15 : vector<64xf32> to vector<64x1xf32>
    %cst_8 = arith.constant 0.000000e+00 : f32
    %17 = vector.broadcast %cst_8 : f32 to vector<64x7xf32>
    %18 = arith.select %5, %10, %17 : vector<64x7xi1>, vector<64x7xf32>
    %cst_9 = arith.constant dense<0.000000e+00> : vector<64xf32>
    %19 = vector.multi_reduction <add>, %18, %cst_9 [1] : vector<64x7xf32> to vector<64xf32>
    %20 = vector.shape_cast %19 : vector<64xf32> to vector<64x1xf32>
    %cst_10 = arith.constant 0.000000e+00 : f32
    %21 = vector.shape_cast %2 : vector<1x7xf32> to vector<1x7xf32>
    %22 = vector.broadcast %21 : vector<1x7xf32> to vector<64x7xf32>
    %23 = vector.broadcast %cst_10 : f32 to vector<64x7xf32>
    %24 = arith.select %5, %22, %23 : vector<64x7xi1>, vector<64x7xf32>
    %cst_11 = arith.constant dense<0.000000e+00> : vector<64xf32>
    %25 = vector.multi_reduction <add>, %24, %cst_11 [1] : vector<64x7xf32> to vector<64xf32>
    %26 = vector.shape_cast %25 : vector<64xf32> to vector<64x1xf32>
    %27 = math.log %12 : vector<64x1xf32>
    %28 = arith.subf %27, %16 : vector<64x1xf32>
    %29 = tpu.reciprocal %12 {approx = true} : vector<64x1xf32> -> vector<64x1xf32>
    %30 = arith.mulf %20, %29 : vector<64x1xf32>
    %cst_12 = arith.constant 1.000000e+00 : f32
    %31 = vector.broadcast %cst_12 : f32 to vector<64x1xf32>
    %32 = arith.subf %31, %30 : vector<64x1xf32>
    %cst_13 = arith.constant 0.000000e+00 : f32
    %33 = vector.broadcast %cst_13 : f32 to vector<64x1xf32>
    %34 = arith.maximumf %32, %33 : vector<64x1xf32>
    %35 = arith.mulf %34, %34 : vector<64x1xf32>
    %36 = arith.mulf %26, %35 : vector<64x1xf32>
    %37 = arith.mulf %36, %28 : vector<64x1xf32>
    %38 = tpu.iota {dimensions = array<i32: 0>} : vector<64x1xi32>
    %c64_i32 = arith.constant 64 : i32
    %39 = vector.broadcast %c64_i32 : i32 to vector<64x1xi32>
    %40 = arith.cmpi slt, %38, %39 : vector<64x1xi32>
    %cst_14 = arith.constant 0.000000e+00 : f32
    %41 = vector.broadcast %cst_14 : f32 to vector<64x1xf32>
    %42 = arith.select %40, %37, %41 : vector<64x1xi1>, vector<64x1xf32>
    %cst_15 = arith.constant dense<0.000000e+00> : vector<1xf32>
    %43 = vector.multi_reduction <add>, %42, %cst_15 [0] : vector<64x1xf32> to vector<1xf32>
    %44 = vector.shape_cast %43 : vector<1xf32> to vector<1x1xf32>
    %45 = tpu.iota {dimensions = array<i32: 1>} : vector<1x128xi32>
    %c0_i32 = arith.constant 0 : i32
    %46 = vector.broadcast %c0_i32 : i32 to vector<1x128xi32>
    %47 = arith.cmpi eq, %45, %46 : vector<1x128xi32>
    %cst_16 = arith.constant 0.000000e+00 : f32
    %48 = vector.shape_cast %44 : vector<1x1xf32> to vector<1x1xf32>
    %49 = vector.broadcast %48 : vector<1x1xf32> to vector<1x128xf32>
    %50 = vector.broadcast %cst_16 : f32 to vector<1x128xf32>
    %51 = arith.select %47, %49, %50 : vector<1x128xi1>, vector<1x128xf32>
    %c0_17 = arith.constant 0 : index
    %c0_18 = arith.constant 0 : index
    %52 = vector.load %arg3[%c0_17, %c0_18] : memref<1x128xf32, #tpu.memory_space<vmem>>, vector<1x128xf32>
    tpu.vector_store %arg3[%c0_17, %c0_18], %51 {strides = array<i32>} : memref<1x128xf32, #tpu.memory_space<vmem>>, vector<1x128xf32>,
    return
  }
}

</mosaic_0001>

<bundles_post_ra>
// kernel: tpu_custom_call.1
= control target key start
LH: loop header
LB: loop body
LE: loop exit
PB: predicated region body
PF: predicated region fallthrough
CT: control target
= control target key end

     0   :  { %vm66_vm0 = vcmask 56320   ;;  %v451_v6 = vmov 0   ;;  %s732_s0 = inlined_call_operand.vmem [shape: f32[64,7], index: 0, kind: input, shape index: {}]   ;;  %s733_s1 = inlined_call_operand.vmem [shape: s32[64,1], index: 1, kind: input, shape index: {}]   ;;  %s734_s2 = inlined_call_operand.vmem [shape: f32[1,7], index: 2, kind: input, shape index: {}]   ;;  %s735_s3 = inlined_call_operand.hbm [shape: f32[1,128], index: 3, kind: output, shape index: {}]  }
   0x1   :  { %v476_v0 = vld [vmem:[%s732_s0 + $0x10] sm:$0xff]  ;;  %v15_v1 = vld [vmem:[%s732_s0] sm:$0xff]  ;;  %v484_v2 = vld [vmem:[%s732_s0 + $0x18] sm:$0xff]  ;;  %380 = vset.pattern.permute.xlu1 %v451_v6  ;;  %379 = vset.pattern.permute.xlu0 %v451_v6 }
   0x2   :  { %v73_v3 = vsel %vm66_vm0, %v476_v0, -inf  ;;  %v67_v4 = vsel %vm66_vm0, %v15_v1, -inf  ;;  %v16_v5 = vld [vmem:[%s732_s0 + $0x8] sm:$0xff]  ;;  %v76_v7 = vsel %vm66_vm0, %v484_v2, -inf  ;;  %v503_v10 = vld [vmem:[%s732_s0 + $0x20] sm:$0xff] }
   0x3   :  { %74 = vmax.xlane.f32.xlu1 %v73_v3  ;;  %68 = vmax.xlane.f32.xlu0 %v67_v4  ;;  %v70_v8 = vsel %vm66_vm0, %v16_v5, -inf  ;;  %v498_v9 = vld [vmem:[%s732_s0 + $0x28] sm:$0xff] }
   0x4   :  { %8 = vsyncpa [#allocation3], 0  ;;  %v82_v11 = vsel %vm66_vm0, %v498_v9, -inf  ;;  %v79_v12 = vsel %vm66_vm0, %v503_v10, -inf  ;;  %v512_v13 = vld [vmem:[%s732_s0 + $0x38] sm:$0xff]  ;;  %v517_v14 = vld [vmem:[%s732_s0 + $0x30] sm:$0xff]  ;;  %v32_v30 = vlaneseq }
   0x5   :  { %v88_v15 = vsel %vm66_vm0, %v512_v13, -inf  ;;  %v85_v16 = vsel %vm66_vm0, %v517_v14, -inf  ;;  %v24_v17 = vld [vmem:[%s733_s1 + $0x8] sm:$0xff]  ;;  %v25_v18 = vld [vmem:[%s733_s1 + $0x10] sm:$0xff]  ;;  %v23_v19 = vld [vmem:[%s733_s1] sm:$0xff] }
   0x6   :  { %v26_v20 = vld [vmem:[%s733_s1 + $0x18] sm:$0xff]  ;;  %v27_v21 = vld [vmem:[%s733_s1 + $0x20] sm:$0xff]  ;;  %v28_v22 = vld [vmem:[%s733_s1 + $0x28] sm:$0xff]  ;;  %v547_v33 = vand.u32 127, %v32_v30 }
   0x7   :  { %77 = vmax.xlane.f32.xlu1 %v76_v7  ;;  %71 = vmax.xlane.f32.xlu0 %v70_v8  ;;  %v29_v23 = vld [vmem:[%s733_s1 + $0x30] sm:$0xff]  ;;  %v30_v24 = vld [vmem:[%s733_s1 + $0x38] sm:$0xff]  ;;  %v552_v34 = vld [vmem:[%s734_s2] ss:$0 sm:$0xff]  ;;  %s452_s1 = smov [#allocation2]  }
   0x8   :  { %s368_s2 = sshll.u32 %s452_s1, 4  ;;  %vm359_vm9 = vcmp.eq.s32.totalorder %v547_v33, 0  ;;  %s369_s2 = int_to_ptr.vmem [resolvable:$true] %s368_s2 }
   0x9   :  { %s429_s18 = scalar_lea.vmem %s369_s2, 16  ;;  %s433_s19 = scalar_lea.vmem %s369_s2, 32 }
   0xa   :  { %p430_p0 = scmp.ne.s32.totalorder %s369_s2, %s429_s18  ;;  %p434_p1 = scmp.lt.s32.totalorder %s369_s2, %s369_s2 }
   0xb   :  { %83 = vmax.xlane.f32.xlu1 %v82_v11  ;;  %80 = vmax.xlane.f32.xlu0 %v79_v12  ;;  %p435_p2 = scmp.lt.s32.totalorder %s433_s19, %s429_s18 }
   0xd   :  { %p436_p3 = por %p435_p2, %p434_p1 }
   0xf   :  { %89 = vmax.xlane.f32.xlu1 %v88_v15  ;;  %86 = vmax.xlane.f32.xlu0 %v85_v16  ;;  %p437_p4 = pnand %p436_p3, %p430_p0 }
  0x20   :  { %38 = vperm.xlu1 %380, %v24_v17  }
  0x24   :  { %41 = vperm.xlu1 %380, %v25_v18  }
  0x25   :  { %35 = vperm.xlu0 %379, %v23_v19  }
  0x28   :  { %44 = vperm.xlu1 %380, %v26_v20  }
  0x2c   :  { %47 = vperm.xlu1 %380, %v27_v21  }
  0x30   :  { %50 = vperm.xlu1 %380, %v28_v22  }
  0x34   :  { %53 = vperm.xlu1 %380, %v29_v23  }
  0x38   :  { %56 = vperm.xlu1 %380, %v30_v24  }
  0x8c   :  { %v75_v25 = vpop.xlane.xlu1 %74  ;;  %v69_v26 = vpop.xlane.xlu0 %68 }
  0x8d   :  { %v91_v37 = vsub.f32 %v15_v1, %v69_v26  ;;  %v93_v43 = vsub.f32 %v476_v0, %v75_v25 }
  0x8f   :  { %v99_v44 = vmul.f32 1.442695, %v91_v37  ;;  %v103_v51 = vmul.f32 1.442695, %v93_v43 }
  0x90   :  { %v78_v27 = vpop.xlane.xlu1 %77  ;;  %v72_v28 = vpop.xlane.xlu0 %71 }
  0x91   :  { %v92_v39 = vsub.f32 %v16_v5, %v72_v28  ;;  %v94_v45 = vsub.f32 %v484_v2, %v78_v27  ;;  %381 = vpow2.f32 %v99_v44 }
  0x93   :  { %v101_v47 = vmul.f32 1.442695, %v92_v39  ;;  %v105_v52 = vmul.f32 1.442695, %v94_v45 }
  0x94   :  { %v84_v29 = vpop.xlane.xlu1 %83  ;;  %v81_v31 = vpop.xlane.xlu0 %80 }
  0x95   :  { %v587_v53 = vsub.f32 %v498_v9, %v84_v29  ;;  %383 = vpow2.f32 %v101_v47  ;;  %v95_v55 = vsub.f32 %v503_v10, %v81_v31 }
  0x96   :  { %385 = vpow2.f32 %v103_v51 }
  0x97   :  { %387 = vpow2.f32 %v105_v52  ;;  %v109_v60 = vmul.f32 1.442695, %v587_v53  ;;  %v107_v63 = vmul.f32 1.442695, %v95_v55 }
  0x98   :  { %v90_v32 = vpop.xlane.xlu1 %89  ;;  %v87_v35 = vpop.xlane.xlu0 %86 }
  0x99   :  { %v605_v61 = vsub.f32 %v512_v13, %v90_v32  ;;  %v612_v0 = vsub.f32 %v517_v14, %v87_v35  ;;  %389 = vpow2.f32 %v109_v60 }
  0x9a   :  { %391 = vpow2.f32 %v107_v63 }
  0x9b   :  { %v113_v5 = vmul.f32 1.442695, %v605_v61  ;;  %v111_v6 = vmul.f32 1.442695, %v612_v0 }
  0x9c   :  { %v554_v36 = vpop.permute.xlu1 %38 }
  0x9d   :  { %vm59_vm1 = vcmp.eq.s32.totalorder %v547_v33, %v554_v36  ;;  %393 = vpow2.f32 %v113_v5 }
  0x9e   :  { %v210_v38 = vsel %vm59_vm1, %v552_v34, 0.0  ;;  %v140_v59 = vsel %vm59_vm1, %v92_v39, 0.0  ;;  %v382_v11 = vpop.eup %381  ;;  %395 = vpow2.f32 %v111_v6 }
  0x9f   :  { %v220_v40 = vsel %vm66_vm0, %v210_v38, 0.0  ;;  %v150_v2 = vsel %vm66_vm0, %v140_v59, 0.0  ;;  %v115_v18 = vsel %vm66_vm0, %v382_v11, 0.0 }
  0xa0   :  { %221 = vadd.xlane.f32.xlu1 %v220_v40  ;;  %v563_v41 = vpop.permute.xlu1 %41  ;;  %v565_v42 = vpop.permute.xlu0 %35 }
  0xa1   :  { %vm60_vm2 = vcmp.eq.s32.totalorder %v547_v33, %v563_v41  ;;  %vm58_vm3 = vcmp.eq.s32.totalorder %v547_v33, %v565_v42 }
  0xa2   :  { %v209_v46 = vsel %vm58_vm3, %v552_v34, 0.0  ;;  %v211_v50 = vsel %vm60_vm2, %v552_v34, 0.0  ;;  %v141_v3 = vsel %vm60_vm2, %v93_v43, 0.0  ;;  %v139_v4 = vsel %vm58_vm3, %v91_v37, 0.0  ;;  %v384_v14 = vpop.eup %383 }
  0xa3   :  { %v217_v48 = vsel %vm66_vm0, %v209_v46, 0.0  ;;  %v223_v57 = vsel %vm66_vm0, %v211_v50, 0.0  ;;  %v153_v7 = vsel %vm66_vm0, %v141_v3, 0.0  ;;  %v147_v8 = vsel %vm66_vm0, %v139_v4, 0.0  ;;  %v386_v15 = vpop.eup %385 }
  0xa4   :  { %v578_v49 = vpop.permute.xlu1 %44  ;;  %218 = vadd.xlane.f32.xlu0 %v217_v48  ;;  %v388_v16 = vpop.eup %387  ;;  %v118_v17 = vsel %vm66_vm0, %v384_v14, 0.0  ;;  %v121_v20 = vsel %vm66_vm0, %v386_v15, 0.0  ;;  %v171_v30 = vsel %vm58_vm3, %v382_v11, 0.0  ;;  %v172_v31 = vsel %vm59_vm1, %v384_v14, 0.0 }
  0xa5   :  { %vm61_vm4 = vcmp.eq.s32.totalorder %v547_v33, %v578_v49  ;;  %v124_v21 = vsel %vm66_vm0, %v388_v16, 0.0  ;;  %v179_v32 = vsel %vm66_vm0, %v171_v30, 0.0  ;;  %v182_v35 = vsel %vm66_vm0, %v172_v31, 0.0 }
  0xa6   :  { %v212_v54 = vsel %vm61_vm4, %v552_v34, 0.0  ;;  %v142_v10 = vsel %vm61_vm4, %v94_v45, 0.0  ;;  %v390_v19 = vpop.eup %389  ;;  %v173_v38 = vsel %vm60_vm2, %v386_v15, 0.0  ;;  %v174_v39 = vsel %vm61_vm4, %v388_v16, 0.0 }
  0xa7   :  { %v226_v56 = vsel %vm66_vm0, %v212_v54, 0.0  ;;  %v156_v13 = vsel %vm66_vm0, %v142_v10, 0.0  ;;  %v392_v22 = vpop.eup %391  ;;  %v130_v25 = vsel %vm66_vm0, %v390_v19, 0.0  ;;  %v185_v36 = vsel %vm66_vm0, %v173_v38, 0.0 }
  0xa8   :  { %227 = vadd.xlane.f32.xlu1 %v226_v56  ;;  %v596_v58 = vpop.permute.xlu1 %47  ;;  %224 = vadd.xlane.f32.xlu0 %v223_v57  ;;  %v127_v24 = vsel %vm66_vm0, %v392_v22, 0.0  ;;  %v188_v40 = vsel %vm66_vm0, %v174_v39, 0.0 }
  0xa9   :  { %vm62_vm5 = vcmp.eq.s32.totalorder %v547_v33, %v596_v58 }
  0xaa   :  { %v213_v62 = vsel %vm62_vm5, %v552_v34, 0.0  ;;  %v143_v9 = vsel %vm62_vm5, %v95_v55, 0.0  ;;  %v394_v23 = vpop.eup %393  ;;  %v175_v42 = vsel %vm62_vm5, %v392_v22, 0.0 }
  0xab   :  { %v229_v1 = vsel %vm66_vm0, %v213_v62, 0.0  ;;  %v159_v12 = vsel %vm66_vm0, %v143_v9, 0.0  ;;  %v396_v26 = vpop.eup %395  ;;  %v136_v29 = vsel %vm66_vm0, %v394_v23, 0.0  ;;  %v191_v44 = vsel %vm66_vm0, %v175_v42, 0.0 }
  0xac   :  { %230 = vadd.xlane.f32.xlu1 %v229_v1  ;;  %151 = vadd.xlane.f32.xlu0 %v150_v2  ;;  %v51_v27 = vpop.permute.xlu1 %50  ;;  %v133_v28 = vsel %vm66_vm0, %v396_v26, 0.0 }
  0xad   :  { %vm63_vm6 = vcmp.eq.s32.totalorder %v547_v33, %v51_v27 }
  0xae   :  { %v176_v41 = vsel %vm63_vm6, %v390_v19, 0.0  ;;  %v144_v46 = vsel %vm63_vm6, %v587_v53, 0.0  ;;  %v214_v51 = vsel %vm63_vm6, %v552_v34, 0.0 }
  0xaf   :  { %v194_v45 = vsel %vm66_vm0, %v176_v41, 0.0  ;;  %v162_v48 = vsel %vm66_vm0, %v144_v46, 0.0  ;;  %v232_v53 = vsel %vm66_vm0, %v214_v51, 0.0 }
  0xb0   :  { %154 = vadd.xlane.f32.xlu0 %v153_v7  ;;  %148 = vadd.xlane.f32.xlu1 %v147_v8  ;;  %v54_v37 = vpop.permute.xlu1 %53 }
  0xb1   :  { %vm64_vm7 = vcmp.eq.s32.totalorder %v547_v33, %v54_v37 }
  0xb2   :  { %v177_v47 = vsel %vm64_vm7, %v396_v26, 0.0  ;;  %v145_v54 = vsel %vm64_vm7, %v612_v0, 0.0  ;;  %v215_v55 = vsel %vm64_vm7, %v552_v34, 0.0 }
  0xb3   :  { %v197_v49 = vsel %vm66_vm0, %v177_v47, 0.0  ;;  %v165_v56 = vsel %vm66_vm0, %v145_v54, 0.0  ;;  %v235_v57 = vsel %vm66_vm0, %v215_v55, 0.0 }
  0xb4   :  { %160 = vadd.xlane.f32.xlu0 %v159_v12  ;;  %157 = vadd.xlane.f32.xlu1 %v156_v13  ;;  %v57_v43 = vpop.permute.xlu1 %56 }
  0xb5   :  { %vm65_vm8 = vcmp.eq.s32.totalorder %v547_v33, %v57_v43 }
  0xb6   :  { %v178_v50 = vsel %vm65_vm8, %v394_v23, 0.0  ;;  %v146_v58 = vsel %vm65_vm8, %v605_v61, 0.0  ;;  %v216_v59 = vsel %vm65_vm8, %v552_v34, 0.0 }
  0xb7   :  { %v200_v52 = vsel %vm66_vm0, %v178_v50, 0.0  ;;  %v168_v60 = vsel %vm66_vm0, %v146_v58, 0.0  ;;  %v238_v62 = vsel %vm66_vm0, %v216_v59, 0.0 }
  0xb8   :  { %119 = vadd.xlane.f32.xlu0 %v118_v17  ;;  %116 = vadd.xlane.f32.xlu1 %v115_v18 }
  0xbc   :  { %122 = vadd.xlane.f32.xlu0 %v121_v20  ;;  %125 = vadd.xlane.f32.xlu1 %v124_v21 }
  0xc0   :  { %128 = vadd.xlane.f32.xlu0 %v127_v24  ;;  %131 = vadd.xlane.f32.xlu1 %v130_v25 }
  0xc4   :  { %134 = vadd.xlane.f32.xlu0 %v133_v28  ;;  %137 = vadd.xlane.f32.xlu1 %v136_v29 }
  0xc8   :  { %180 = vadd.xlane.f32.xlu0 %v179_v32  ;;  %183 = vadd.xlane.f32.xlu1 %v182_v35 }
  0xcc   :  { %186 = vadd.xlane.f32.xlu0 %v185_v36  ;;  %189 = vadd.xlane.f32.xlu1 %v188_v40 }
  0xd0   :  { %192 = vadd.xlane.f32.xlu0 %v191_v44  ;;  %195 = vadd.xlane.f32.xlu1 %v194_v45 }
  0xd4   :  { %163 = vadd.xlane.f32.xlu0 %v162_v48  ;;  %198 = vadd.xlane.f32.xlu1 %v197_v49 }
  0xd8   :  { %201 = vadd.xlane.f32.xlu0 %v200_v52  ;;  %233 = vadd.xlane.f32.xlu1 %v232_v53 }
  0xdc   :  { %166 = vadd.xlane.f32.xlu0 %v165_v56  ;;  %236 = vadd.xlane.f32.xlu1 %v235_v57 }
  0xe0   :  { %169 = vadd.xlane.f32.xlu0 %v168_v60  ;;  %239 = vadd.xlane.f32.xlu1 %v238_v62 }
 0x129   :  { %v698_v63 = vpop.xlane.xlu1 %221 }
 0x12d   :  { %v700_v0 = vpop.xlane.xlu0 %218 }
 0x131   :  { %v702_v1 = vpop.xlane.xlu1 %227  ;;  %v704_v2 = vpop.xlane.xlu0 %224 }
 0x135   :  { %v706_v3 = vpop.xlane.xlu1 %230  ;;  %v708_v61 = vpop.xlane.xlu0 %151 }
 0x139   :  { %v710_v4 = vpop.xlane.xlu0 %154  ;;  %v712_v34 = vpop.xlane.xlu1 %148 }
 0x13d   :  { %v714_v5 = vpop.xlane.xlu0 %160  ;;  %v716_v6 = vpop.xlane.xlu1 %157 }
 0x141   :  { %v120_v7 = vpop.xlane.xlu0 %119  ;;  %v117_v8 = vpop.xlane.xlu1 %116 }
 0x142   :  { %397 = vlog2.f32 %v120_v7 }
 0x143   :  { %399 = vrcp.f32 %v120_v7 }
 0x144   :  { %401 = vlog2.f32 %v117_v8 }
 0x145   :  { %403 = vrcp.f32 %v117_v8  ;;  %v123_v9 = vpop.xlane.xlu0 %122  ;;  %v126_v10 = vpop.xlane.xlu1 %125 }
 0x146   :  { %405 = vlog2.f32 %v123_v9 }
 0x147   :  { %407 = vrcp.f32 %v123_v9 }
 0x148   :  { %409 = vrcp.f32 %v126_v10 }
 0x149   :  { %v129_v11 = vpop.xlane.xlu0 %128  ;;  %v132_v12 = vpop.xlane.xlu1 %131  ;;  %411 = vlog2.f32 %v126_v10 }
 0x14a   :  { %413 = vlog2.f32 %v129_v11 }
 0x14b   :  { %415 = vrcp.f32 %v129_v11 }
 0x14c   :  { %417 = vrcp.f32 %v132_v12 }
 0x14d   :  { %v135_v13 = vpop.xlane.xlu0 %134  ;;  %v138_v14 = vpop.xlane.xlu1 %137 }
 0x14e   :  { %419 = vrcp.f32 %v135_v13 }
 0x14f   :  { %v398_v15 = vpop.eup %397  ;;  %421 = vlog2.f32 %v132_v12 }
 0x150   :  { %v400_v16 = vpop.eup %399  ;;  %423 = vlog2.f32 %v135_v13  ;;  %v244_v26 = vmul.f32 0.6931472, %v398_v15 }
 0x151   :  { %v402_v17 = vpop.eup %401  ;;  %v181_v18 = vpop.xlane.xlu0 %180  ;;  %425 = vrcp.f32 %v138_v14 }
 0x152   :  { %v184_v19 = vpop.xlane.xlu1 %183  ;;  %v404_v20 = vpop.eup %403  ;;  %v242_v27 = vmul.f32 0.6931472, %v402_v17  ;;  %427 = vlog2.f32 %v138_v14  ;;  %v258_v43 = vsub.f32 %v244_v26, %v708_v61 }
 0x153   :  { %v274_v21 = vmul.f32 %v400_v16, %v184_v19  ;;  %v273_v22 = vmul.f32 %v404_v20, %v181_v18  ;;  %v406_v23 = vpop.eup %405 }
 0x154   :  { %v408_v25 = vpop.eup %407  ;;  %v257_v44 = vsub.f32 %v242_v27, %v712_v34  ;;  %v246_v50 = vmul.f32 0.6931472, %v406_v23 }
 0x155   :  { %v282_v24 = vsub.f32 1.0, %v274_v21  ;;  %v281_v28 = vsub.f32 1.0, %v273_v22  ;;  %v187_v29 = vpop.xlane.xlu0 %186  ;;  %v410_v31 = vpop.eup %409 }
 0x156   :  { %v190_v30 = vpop.xlane.xlu1 %189  ;;  %v275_v35 = vmul.f32 %v408_v25, %v187_v29  ;;  %v412_v37 = vpop.eup %411 }
 0x157   :  { %v290_v32 = vmax.f32 %v282_v24, 0.0  ;;  %v289_v38 = vmax.f32 %v281_v28, 0.0  ;;  %v276_v39 = vmul.f32 %v410_v31, %v190_v30  ;;  %v414_v36 = vpop.eup %413  ;;  %v248_v54 = vmul.f32 0.6931472, %v412_v37 }
 0x158   :  { %v283_v42 = vsub.f32 1.0, %v275_v35  ;;  %v416_v41 = vpop.eup %415  ;;  %v250_v61 = vmul.f32 0.6931472, %v414_v36 }
 0x159   :  { %v298_v40 = vmul.f32 %v290_v32, %v290_v32  ;;  %v297_v45 = vmul.f32 %v289_v38, %v289_v38  ;;  %v284_v46 = vsub.f32 1.0, %v276_v39  ;;  %v193_v47 = vpop.xlane.xlu0 %192  ;;  %v418_v49 = vpop.eup %417 }
 0x15a   :  { %v196_v48 = vpop.xlane.xlu1 %195  ;;  %v291_v52 = vmax.f32 %v283_v42, 0.0  ;;  %v277_v53 = vmul.f32 %v416_v41, %v193_v47  ;;  %v261_v23 = vsub.f32 %v250_v61, %v714_v5 }
 0x15b   :  { %v306_v51 = vmul.f32 %v298_v40, %v698_v63  ;;  %v305_v55 = vmul.f32 %v297_v45, %v700_v0  ;;  %v292_v56 = vmax.f32 %v284_v46, 0.0  ;;  %v278_v57 = vmul.f32 %v418_v49, %v196_v48  ;;  %v420_v62 = vpop.eup %419 }
 0x15c   :  { %v299_v59 = vmul.f32 %v291_v52, %v291_v52  ;;  %v285_v60 = vsub.f32 1.0, %v277_v53  ;;  %v422_v11 = vpop.eup %421  ;;  %v259_v63 = vsub.f32 %v246_v50, %v710_v4  ;;  %v260_v0 = vsub.f32 %v248_v54, %v716_v6 }
 0x15d   :  { %v314_v58 = vmul.f32 %v306_v51, %v258_v43  ;;  %v313_v34 = vmul.f32 %v305_v55, %v257_v44  ;;  %v300_v7 = vmul.f32 %v292_v56, %v292_v56  ;;  %v286_v8 = vsub.f32 1.0, %v278_v57  ;;  %v164_v9 = vpop.xlane.xlu0 %163  ;;  %v424_v17 = vpop.eup %423 }
 0x15e   :  { %v199_v10 = vpop.xlane.xlu1 %198  ;;  %v307_v12 = vmul.f32 %v299_v59, %v704_v2  ;;  %v293_v13 = vmax.f32 %v285_v60, 0.0  ;;  %v426_v22 = vpop.eup %425  ;;  %v252_v4 = vmul.f32 0.6931472, %v422_v11  ;;  %v254_v31 = vmul.f32 0.6931472, %v424_v17 }
 0x15f   :  { %v279_v14 = vmul.f32 %v420_v62, %v199_v10  ;;  %v308_v15 = vmul.f32 %v300_v7, %v702_v1  ;;  %v294_v16 = vmax.f32 %v286_v8, 0.0  ;;  %v346_v18 = vadd.f32 %v314_v58, %v313_v34  ;;  %v428_v39 = vpop.eup %427 }
 0x160   :  { %v315_v19 = vmul.f32 %v307_v12, %v259_v63  ;;  %v301_v20 = vmul.f32 %v293_v13, %v293_v13  ;;  %v262_v1 = vsub.f32 %v252_v4, %v164_v9  ;;  %v256_v47 = vmul.f32 0.6931472, %v428_v39 }
 0x161   :  { %v287_v21 = vsub.f32 1.0, %v279_v14  ;;  %v316_v24 = vmul.f32 %v308_v15, %v260_v0  ;;  %v302_v25 = vmul.f32 %v294_v16, %v294_v16  ;;  %v202_v26 = vpop.xlane.xlu0 %201 }
 0x162   :  { %v234_v2 = vpop.xlane.xlu1 %233  ;;  %v347_v27 = vadd.f32 %v346_v18, %v315_v19  ;;  %v309_v28 = vmul.f32 %v301_v20, %v706_v3  ;;  %v280_v29 = vmul.f32 %v426_v22, %v202_v26 }
 0x163   :  { %v295_v6 = vmax.f32 %v287_v21, 0.0  ;;  %v310_v30 = vmul.f32 %v302_v25, %v234_v2 }
 0x164   :  { %v348_v32 = vadd.f32 %v347_v27, %v316_v24  ;;  %v317_v35 = vmul.f32 %v309_v28, %v261_v23  ;;  %v288_v38 = vsub.f32 1.0, %v280_v29 }
 0x165   :  { %v303_v37 = vmul.f32 %v295_v6, %v295_v6  ;;  %v318_v36 = vmul.f32 %v310_v30, %v262_v1  ;;  %v167_v5 = vpop.xlane.xlu0 %166 }
 0x166   :  { %v237_v40 = vpop.xlane.xlu1 %236  ;;  %v296_v42 = vmax.f32 %v288_v38, 0.0  ;;  %v349_v41 = vadd.f32 %v348_v32, %v317_v35  ;;  %v263_v43 = vsub.f32 %v254_v31, %v167_v5 }
 0x167   :  { %v311_v44 = vmul.f32 %v303_v37, %v237_v40 }
 0x168   :  { %v304_v45 = vmul.f32 %v296_v42, %v296_v42  ;;  %v350_v46 = vadd.f32 %v349_v41, %v318_v36 }
 0x169   :  { %v319_v3 = vmul.f32 %v311_v44, %v263_v43  ;;  %v170_v48 = vpop.xlane.xlu0 %169 }
 0x16a   :  { %v240_v49 = vpop.xlane.xlu1 %239  ;;  %v264_v50 = vsub.f32 %v256_v47, %v170_v48 }
 0x16b   :  { %v312_v51 = vmul.f32 %v304_v45, %v240_v49  ;;  %v351_v52 = vadd.f32 %v350_v46, %v319_v3 }
 0x16d   :  { %v320_v53 = vmul.f32 %v312_v51, %v264_v50 }
 0x16f   :  { %v352_v54 = vadd.f32 %v351_v52, %v320_v53 }
 0x171   :  { %v353_v55 = vrot.slane %v352_v54, 4 }
 0x173   :  { %v354_v56 = vadd.f32 %v353_v55, %v352_v54 }
 0x175   :  { %v355_v57 = vrot.slane %v354_v56, 2 }
 0x177   :  { %v356_v58 = vadd.f32 %v355_v57, %v354_v56 }
 0x179   :  { %v357_v59 = vrot.slane %v356_v58, 1 }
 0x17b   :  { %v358_v60 = vadd.f32 %v357_v59, %v356_v58 }
 0x17d   :  { %v360_v62 = vsel %vm359_vm9, %v358_v60, 0.0 }
 0x17e   :  { %361 = vst [vmem:[#allocation2] sm:$0x1] %v360_v62 }
 0x17f   :  { %440 = shalt.err (!%p437_p4)
}
 0x180   :  { %371 = dma.vmem_to_hbm [thread:$0]  %s369_s2, 16, %s735_s3, [#allocation3]  }
 0x181   :  { %449 = dma.done.wait [#allocation3], 16  }
 0x182   :  { %450 = vsyncadd [#allocation3], 4294967280 }
 0x183   :  { %375 = vsyncpa [#allocation3], 1 }

</bundles_post_ra>
